<compile_context>
chip_gen: v6e
topology: v6e:2x2x1
jax: 0.10.0
libtpu: 0.0.40
codegen_flags: <defaults>
</compile_context>

<pallas_src>
import jax
import jax.numpy as jnp
from jax.experimental import pallas as pl
from jax.experimental.pallas import tpu as pltpu  # noqa: F401  (TPU backend)

# --- config (small, consistent with the module) ---------------------------
B, S, D = 2, 8, 32            # batch, seq, d_model
H = 4                         # n_heads
HD = D // H                   # head_dim
FFN = 64                      # ffn_dim
EPS = 1e-5                    # nn.LayerNorm default eps
BS = B * S
HALF = HD // 2
SCALE = 1.0 / (HD ** 0.5)


def _layer_norm(x, gamma, beta):
    mu = jnp.mean(x, axis=-1, keepdims=True)
    var = jnp.mean((x - mu) ** 2, axis=-1, keepdims=True)
    return (x - mu) * jax.lax.rsqrt(var + EPS) * gamma + beta


# --------------------------- fused kernel ---------------------------------
def roformer_decoder_kernel(x_ref, rope_ref, wblob_ref, w2_ref, vec_ref, out_ref):
    x = x_ref[...]                        # (BS, D)       flattened rows
    rope = rope_ref[...]                  # (BS, 2D)      [cos | sin], head+batch tiled
    wblob = wblob_ref[...]                # (D, 8D)       [wq|wk|wv|wq@R|wk@R | wo | w1]
    w2 = w2_ref[...]                      # (FFN, D)
    vec = vec_ref[...]                    # (8, 5D)       row0 fused qkv(+rot) bias, rows 1..7 small vecs

    w_qkvr = wblob[:, 0:5 * D]            # (D, 5D)
    w_o    = wblob[:, 5 * D:6 * D]        # (D, D)
    w_1    = wblob[:, 6 * D:6 * D + FFN]  # (D, FFN)

    b_qkvr = vec[0:1, 0:5 * D]
    b_o    = vec[1:2, 0:D]
    g1     = vec[2:3, 0:D]
    be1    = vec[3:4, 0:D]
    b_1    = vec[4:5, 0:FFN]
    b_2    = vec[5:6, 0:D]
    g2     = vec[6:7, 0:D]
    be2    = vec[7:8, 0:D]

    # One fused projection: [q | k | v | rot(q) | rot(k)] in a single MXU matmul.
    qkvr = jnp.dot(x, w_qkvr, preferred_element_type=jnp.float32) + b_qkvr

    cos = rope[:, 0:D]
    sin = rope[:, D:2 * D]
    # RoPE full-width: rotate-half already baked into the projection, so this is
    # pure VPU multiply-add (no lane permutes).
    q = qkvr[:, 0 * D:1 * D] * cos + qkvr[:, 3 * D:4 * D] * sin
    k = qkvr[:, 1 * D:2 * D] * cos + qkvr[:, 4 * D:5 * D] * sin
    v = qkvr[:, 2 * D:3 * D]

    # Attention, batched over B (tile-aligned reshapes: 16 = 2 x 8 sublanes).
    q3 = q.reshape(B, S, D)
    k3 = k.reshape(B, S, D)
    v3 = v.reshape(B, S, D)

    attn = jnp.zeros((BS, D), jnp.float32)
    for h in range(H):                                     # static loop over 4 heads
        lo = h * HD
        qh = q3[:, :, lo:lo + HD]                          # (B, S, HD)
        kh = k3[:, :, lo:lo + HD]
        vh = v3[:, :, lo:lo + HD]
        s = jnp.einsum('bqd,bkd->bqk', qh, kh,
                       preferred_element_type=jnp.float32) * SCALE   # no .T materialized
        s = s - jnp.max(s, axis=-1, keepdims=True)
        p = jnp.exp(s)
        p = p * pl.reciprocal(jnp.sum(p, axis=-1, keepdims=True), approx=True)
        ctx = jnp.einsum('bqk,bkd->bqd', p, vh,
                         preferred_element_type=jnp.float32)         # (B, S, HD)
        # Fold this head's slice of W_O here -> no lane concatenate of heads.
        attn = attn + jnp.dot(ctx.reshape(BS, HD), w_o[lo:lo + HD, :],
                              preferred_element_type=jnp.float32)

    attn = attn + b_o
    y = _layer_norm(x + attn, g1, be1)            # residual + LN1 (dropout1 = identity)

    h1 = jnp.maximum(jnp.dot(y, w_1, preferred_element_type=jnp.float32) + b_1, 0.0)
    f = jnp.dot(h1, w2, preferred_element_type=jnp.float32) + b_2

    out_ref[...] = _layer_norm(y + f, g2, be2)    # residual + LN2 (dropout2 = identity)


# --------------------------- host-side packing ----------------------------
def _rot_matrix():
    """(D, D) signed permutation R s.t. (x @ R) == rotate_half(x) per head."""
    R = jnp.zeros((D, D), jnp.float32)
    for h in range(H):
        lo = h * HD
        for j in range(HALF):
            R = R.at[lo + HALF + j, lo + j].set(-1.0)
            R = R.at[lo + j, lo + HALF + j].set(1.0)
    return R


def pack_operands(x, cos, sin, weights):
    (wq, bq, wk, bk, wv, bv, wo, bo,
     g1, be1, w1, b1, w2, b2, g2, be2) = weights

    R = _rot_matrix()
    w_qkvr = jnp.concatenate([wq, wk, wv, wq @ R, wk @ R], axis=1)     # (D, 5D)
    b_qkvr = jnp.concatenate([bq, bk, bv, bq @ R, bk @ R], axis=1)     # (1, 5D)
    w_blob = jnp.concatenate([w_qkvr, wo, w1], axis=1)                 # (D, 8D)

    def pad_row(v):                                                    # (1, n) -> (1, 5D)
        return jnp.pad(v, ((0, 0), (0, 5 * D - v.shape[1])))

    vec_blob = jnp.concatenate(
        [b_qkvr] + [pad_row(t) for t in (bo, g1, be1, b1, b2, g2, be2)],
        axis=0)                                                        # (8, 5D)

    cos_full = jnp.tile(cos, (B, H))                                   # (BS, D)
    sin_full = jnp.tile(sin, (B, H))
    rope_tab = jnp.concatenate([cos_full, sin_full], axis=1)           # (BS, 2D)

    x2d = x.reshape(BS, D)
    return x2d, rope_tab, w_blob, w2, vec_blob


def roformer_decoder_layer(x, cos, sin, weights):
    """x: (B, S, D) f32; cos/sin: (S, HD); weights: tuple of 2-D f32 arrays."""
    x2d, rope_tab, w_blob, w2, vec_blob = pack_operands(x, cos, sin, weights)
    out2d = pl.pallas_call(
        roformer_decoder_kernel,
        out_shape=jax.ShapeDtypeStruct((BS, D), jnp.float32),
    )(x2d, rope_tab, w_blob, w2, vec_blob)
    return out2d.reshape(B, S, D)


# --- pure-JAX reference (original unpacked math) for a correctness check ---
def reference(x, cos, sin, weights):
    (wq, bq, wk, bk, wv, bv, wo, bo,
     g1, be1, w1, b1, w2, b2, g2, be2) = weights

    def one(xb):
        q = xb @ wq + bq
        k = xb @ wk + bk
        v = xb @ wv + bv

        def rope(t):
            rot = jnp.concatenate([-t[:, HALF:], t[:, :HALF]], axis=-1)
            return t * cos + rot * sin

        parts = []
        for h in range(H):
            lo = h * HD
            qh, kh, vh = rope(q[:, lo:lo + HD]), rope(k[:, lo:lo + HD]), v[:, lo:lo + HD]
            p = jax.nn.softmax((qh @ kh.T) * SCALE, axis=-1)
            parts.append(p @ vh)
        ctx = jnp.concatenate(parts, axis=-1)
        y = _layer_norm(xb + ctx @ wo + bo, g1, be1)
        f = jnp.maximum(y @ w1 + b1, 0.0) @ w2 + b2
        return _layer_norm(y + f, g2, be2)

    return jax.vmap(one)(x)


def make_params(key):
    ks = jax.random.split(key, 16)
    init = lambda k, shp, s=0.02: (s * jax.random.normal(k, shp)).astype(jnp.float32)
    wq = init(ks[0], (D, D));   bq = init(ks[1], (1, D))
    wk = init(ks[2], (D, D));   bk = init(ks[3], (1, D))
    wv = init(ks[4], (D, D));   bv = init(ks[5], (1, D))
    wo = init(ks[6], (D, D));   bo = init(ks[7], (1, D))
    g1 = 1.0 + init(ks[8], (1, D), 0.1);  be1 = init(ks[9], (1, D), 0.05)
    w1 = init(ks[10], (D, FFN)); b1 = init(ks[11], (1, FFN))
    w2 = init(ks[12], (FFN, D)); b2 = init(ks[13], (1, D))
    g2 = 1.0 + init(ks[14], (1, D), 0.1); be2 = init(ks[15], (1, D), 0.05)
    return (wq, bq, wk, bk, wv, bv, wo, bo,
            g1, be1, w1, b1, w2, b2, g2, be2)


def make_rope_tables():
    inv_freq = 1.0 / (10000.0 ** (jnp.arange(0, HD, 2, dtype=jnp.float32) / HD))
    pos = jnp.arange(S, dtype=jnp.float32)
    freqs = pos[:, None] * inv_freq[None, :]                            # (S, HD/2)
    cos = jnp.concatenate([jnp.cos(freqs), jnp.cos(freqs)], axis=-1)    # (S, HD)
    sin = jnp.concatenate([jnp.sin(freqs), jnp.sin(freqs)], axis=-1)    # (S, HD)
    return cos.astype(jnp.float32), sin.astype(jnp.float32)


if __name__ == "__main__":
    key = jax.random.PRNGKey(0)
    k_x, k_w = jax.random.split(key)
    x = jax.random.normal(k_x, (B, S, D), dtype=jnp.float32)
    weights = make_params(k_w)
    cos, sin = make_rope_tables()

    out = jax.block_until_ready(roformer_decoder_layer(x, cos, sin, weights))
    ref = jax.block_until_ready(reference(x, cos, sin, weights))

    assert out.shape == (B, S, D)
    assert jnp.allclose(out, ref, atol=2e-3, rtol=2e-3), float(jnp.max(jnp.abs(out - ref)))
    print("KERNEL_OK")
</pallas_src>

<mosaic_0001>
module attributes {stable_mosaic.version = 11 : i64} {
  func.func @roformer_decoder_kernel(%arg0: memref<16x32xf32, #tpu.memory_space<vmem>>, %arg1: memref<16x64xf32, #tpu.memory_space<vmem>>, %arg2: memref<32x256xf32, #tpu.memory_space<vmem>>, %arg3: memref<64x32xf32, #tpu.memory_space<vmem>>, %arg4: memref<8x160xf32, #tpu.memory_space<vmem>>, %arg5: memref<16x32xf32, #tpu.memory_space<vmem>>) attributes {dimension_semantics = [], scalar_prefetch = 0 : i64, scratch_operands = 0 : i64, tpu.core_type = #tpu.core_type<tc>} {
    %c0 = arith.constant 0 : index
    %c0_0 = arith.constant 0 : index
    %0 = vector.load %arg0[%c0, %c0_0] : memref<16x32xf32, #tpu.memory_space<vmem>>, vector<16x32xf32>
    %c0_1 = arith.constant 0 : index
    %c0_2 = arith.constant 0 : index
    %1 = vector.load %arg1[%c0_1, %c0_2] : memref<16x64xf32, #tpu.memory_space<vmem>>, vector<16x64xf32>
    %c0_3 = arith.constant 0 : index
    %c0_4 = arith.constant 0 : index
    %2 = vector.load %arg2[%c0_3, %c0_4] : memref<32x256xf32, #tpu.memory_space<vmem>>, vector<32x256xf32>
    %c0_5 = arith.constant 0 : index
    %c0_6 = arith.constant 0 : index
    %3 = vector.load %arg3[%c0_5, %c0_6] : memref<64x32xf32, #tpu.memory_space<vmem>>, vector<64x32xf32>
    %c0_7 = arith.constant 0 : index
    %c0_8 = arith.constant 0 : index
    %4 = vector.load %arg4[%c0_7, %c0_8] : memref<8x160xf32, #tpu.memory_space<vmem>>, vector<8x160xf32>
    %5 = vector.extract_strided_slice %2 {offsets = [0, 0], sizes = [32, 160], strides = [1, 1]} : vector<32x256xf32> to vector<32x160xf32>
    %6 = vector.extract_strided_slice %2 {offsets = [0, 160], sizes = [32, 32], strides = [1, 1]} : vector<32x256xf32> to vector<32x32xf32>
    %7 = vector.extract_strided_slice %2 {offsets = [0, 192], sizes = [32, 64], strides = [1, 1]} : vector<32x256xf32> to vector<32x64xf32>
    %8 = vector.extract_strided_slice %4 {offsets = [0, 0], sizes = [1, 160], strides = [1, 1]} : vector<8x160xf32> to vector<1x160xf32>
    %9 = vector.extract_strided_slice %4 {offsets = [1, 0], sizes = [1, 32], strides = [1, 1]} : vector<8x160xf32> to vector<1x32xf32>
    %10 = vector.extract_strided_slice %4 {offsets = [2, 0], sizes = [1, 32], strides = [1, 1]} : vector<8x160xf32> to vector<1x32xf32>
    %11 = vector.extract_strided_slice %4 {offsets = [3, 0], sizes = [1, 32], strides = [1, 1]} : vector<8x160xf32> to vector<1x32xf32>
    %12 = vector.extract_strided_slice %4 {offsets = [4, 0], sizes = [1, 64], strides = [1, 1]} : vector<8x160xf32> to vector<1x64xf32>
    %13 = vector.extract_strided_slice %4 {offsets = [5, 0], sizes = [1, 32], strides = [1, 1]} : vector<8x160xf32> to vector<1x32xf32>
    %14 = vector.extract_strided_slice %4 {offsets = [6, 0], sizes = [1, 32], strides = [1, 1]} : vector<8x160xf32> to vector<1x32xf32>
    %15 = vector.extract_strided_slice %4 {offsets = [7, 0], sizes = [1, 32], strides = [1, 1]} : vector<8x160xf32> to vector<1x32xf32>
    %cst = arith.constant dense<0.000000e+00> : vector<16x160xf32>
    %16 = tpu.matmul %0, %5, %cst {dimension_numbers = #tpu.dot_dimension_numbers<[1], [0], [0], [1], [0, 0, 1, 1], [], []>} : vector<16x32xf32>, vector<32x160xf32>, vector<16x160xf32> -> vector<16x160xf32>
    %17 = vector.broadcast %8 : vector<1x160xf32> to vector<16x160xf32>
    %18 = arith.addf %16, %17 : vector<16x160xf32>
    %19 = vector.extract_strided_slice %1 {offsets = [0, 0], sizes = [16, 32], strides = [1, 1]} : vector<16x64xf32> to vector<16x32xf32>
    %20 = vector.extract_strided_slice %1 {offsets = [0, 32], sizes = [16, 32], strides = [1, 1]} : vector<16x64xf32> to vector<16x32xf32>
    %21 = vector.extract_strided_slice %18 {offsets = [0, 0], sizes = [16, 32], strides = [1, 1]} : vector<16x160xf32> to vector<16x32xf32>
    %22 = arith.mulf %21, %19 : vector<16x32xf32>
    %23 = vector.extract_strided_slice %18 {offsets = [0, 96], sizes = [16, 32], strides = [1, 1]} : vector<16x160xf32> to vector<16x32xf32>
    %24 = arith.mulf %23, %20 : vector<16x32xf32>
    %25 = arith.addf %22, %24 : vector<16x32xf32>
    %26 = vector.extract_strided_slice %18 {offsets = [0, 32], sizes = [16, 32], strides = [1, 1]} : vector<16x160xf32> to vector<16x32xf32>
    %27 = arith.mulf %26, %19 : vector<16x32xf32>
    %28 = vector.extract_strided_slice %18 {offsets = [0, 128], sizes = [16, 32], strides = [1, 1]} : vector<16x160xf32> to vector<16x32xf32>
    %29 = arith.mulf %28, %20 : vector<16x32xf32>
    %30 = arith.addf %27, %29 : vector<16x32xf32>
    %31 = vector.extract_strided_slice %18 {offsets = [0, 64], sizes = [16, 32], strides = [1, 1]} : vector<16x160xf32> to vector<16x32xf32>
    %32 = vector.shape_cast %25 : vector<16x32xf32> to vector<2x8x32xf32>
    %33 = vector.shape_cast %30 : vector<16x32xf32> to vector<2x8x32xf32>
    %34 = vector.shape_cast %31 : vector<16x32xf32> to vector<2x8x32xf32>
    %cst_9 = arith.constant 0.000000e+00 : f32
    %35 = vector.broadcast %cst_9 : f32 to vector<16x32xf32>
    %36 = vector.extract_strided_slice %32 {offsets = [0, 0, 0], sizes = [2, 8, 8], strides = [1, 1, 1]} : vector<2x8x32xf32> to vector<2x8x8xf32>
    %37 = vector.extract_strided_slice %33 {offsets = [0, 0, 0], sizes = [2, 8, 8], strides = [1, 1, 1]} : vector<2x8x32xf32> to vector<2x8x8xf32>
    %38 = vector.extract_strided_slice %34 {offsets = [0, 0, 0], sizes = [2, 8, 8], strides = [1, 1, 1]} : vector<2x8x32xf32> to vector<2x8x8xf32>
    "tpu.trace_start"() <{level = 10 : i32, message = "bqd,bkd->bqk"}> : () -> ()
    %cst_10 = arith.constant dense<0.000000e+00> : vector<2x8x8xf32>
    %39 = tpu.matmul %36, %37, %cst_10 {dimension_numbers = #tpu.dot_dimension_numbers<[2], [2], [1], [1], [0, 0, 0, 1, 1, 1], [0], [0]>} : vector<2x8x8xf32>, vector<2x8x8xf32>, vector<2x8x8xf32> -> vector<2x8x8xf32>
    "tpu.trace_stop"() : () -> ()
    %cst_11 = arith.constant 0.353553385 : f32
    %40 = vector.broadcast %cst_11 : f32 to vector<2x8x8xf32>
    %41 = arith.mulf %39, %40 : vector<2x8x8xf32>
    %cst_12 = arith.constant dense<0xFF800000> : vector<2x8xf32>
    %42 = vector.multi_reduction <maximumf>, %41, %cst_12 [2] : vector<2x8x8xf32> to vector<2x8xf32>
    %43 = vector.shape_cast %42 : vector<2x8xf32> to vector<2x8x1xf32>
    %44 = vector.broadcast %43 : vector<2x8x1xf32> to vector<2x8x8xf32>
    %45 = arith.subf %41, %44 : vector<2x8x8xf32>
    %46 = math.exp %45 : vector<2x8x8xf32>
    %cst_13 = arith.constant dense<0.000000e+00> : vector<2x8xf32>
    %47 = vector.multi_reduction <add>, %46, %cst_13 [2] : vector<2x8x8xf32> to vector<2x8xf32>
    %48 = vector.shape_cast %47 : vector<2x8xf32> to vector<2x8x1xf32>
    %49 = tpu.reciprocal %48 {approx = true} : vector<2x8x1xf32> -> vector<2x8x1xf32>
    %50 = vector.broadcast %49 : vector<2x8x1xf32> to vector<2x8x8xf32>
    %51 = arith.mulf %46, %50 : vector<2x8x8xf32>
    "tpu.trace_start"() <{level = 10 : i32, message = "bqk,bkd->bqd"}> : () -> ()
    %cst_14 = arith.constant dense<0.000000e+00> : vector<2x8x8xf32>
    %52 = tpu.matmul %51, %38, %cst_14 {dimension_numbers = #tpu.dot_dimension_numbers<[2], [1], [1], [2], [0, 0, 0, 1, 1, 2], [0], [0]>} : vector<2x8x8xf32>, vector<2x8x8xf32>, vector<2x8x8xf32> -> vector<2x8x8xf32>
    "tpu.trace_stop"() : () -> ()
    %53 = vector.shape_cast %52 : vector<2x8x8xf32> to vector<16x8xf32>
    %54 = vector.extract_strided_slice %6 {offsets = [0, 0], sizes = [8, 32], strides = [1, 1]} : vector<32x32xf32> to vector<8x32xf32>
    %cst_15 = arith.constant dense<0.000000e+00> : vector<16x32xf32>
    %55 = tpu.matmul %53, %54, %cst_15 {dimension_numbers = #tpu.dot_dimension_numbers<[1], [0], [0], [1], [0, 0, 1, 1], [], []>} : vector<16x8xf32>, vector<8x32xf32>, vector<16x32xf32> -> vector<16x32xf32>
    %56 = arith.addf %35, %55 : vector<16x32xf32>
    %57 = vector.extract_strided_slice %32 {offsets = [0, 0, 8], sizes = [2, 8, 8], strides = [1, 1, 1]} : vector<2x8x32xf32> to vector<2x8x8xf32>
    %58 = vector.extract_strided_slice %33 {offsets = [0, 0, 8], sizes = [2, 8, 8], strides = [1, 1, 1]} : vector<2x8x32xf32> to vector<2x8x8xf32>
    %59 = vector.extract_strided_slice %34 {offsets = [0, 0, 8], sizes = [2, 8, 8], strides = [1, 1, 1]} : vector<2x8x32xf32> to vector<2x8x8xf32>
    "tpu.trace_start"() <{level = 10 : i32, message = "bqd,bkd->bqk"}> : () -> ()
    %cst_16 = arith.constant dense<0.000000e+00> : vector<2x8x8xf32>
    %60 = tpu.matmul %57, %58, %cst_16 {dimension_numbers = #tpu.dot_dimension_numbers<[2], [2], [1], [1], [0, 0, 0, 1, 1, 1], [0], [0]>} : vector<2x8x8xf32>, vector<2x8x8xf32>, vector<2x8x8xf32> -> vector<2x8x8xf32>
    "tpu.trace_stop"() : () -> ()
    %cst_17 = arith.constant 0.353553385 : f32
    %61 = vector.broadcast %cst_17 : f32 to vector<2x8x8xf32>
    %62 = arith.mulf %60, %61 : vector<2x8x8xf32>
    %cst_18 = arith.constant dense<0xFF800000> : vector<2x8xf32>
    %63 = vector.multi_reduction <maximumf>, %62, %cst_18 [2] : vector<2x8x8xf32> to vector<2x8xf32>
    %64 = vector.shape_cast %63 : vector<2x8xf32> to vector<2x8x1xf32>
    %65 = vector.broadcast %64 : vector<2x8x1xf32> to vector<2x8x8xf32>
    %66 = arith.subf %62, %65 : vector<2x8x8xf32>
    %67 = math.exp %66 : vector<2x8x8xf32>
    %cst_19 = arith.constant dense<0.000000e+00> : vector<2x8xf32>
    %68 = vector.multi_reduction <add>, %67, %cst_19 [2] : vector<2x8x8xf32> to vector<2x8xf32>
    %69 = vector.shape_cast %68 : vector<2x8xf32> to vector<2x8x1xf32>
    %70 = tpu.reciprocal %69 {approx = true} : vector<2x8x1xf32> -> vector<2x8x1xf32>
    %71 = vector.broadcast %70 : vector<2x8x1xf32> to vector<2x8x8xf32>
    %72 = arith.mulf %67, %71 : vector<2x8x8xf32>
    "tpu.trace_start"() <{level = 10 : i32, message = "bqk,bkd->bqd"}> : () -> ()
    %cst_20 = arith.constant dense<0.000000e+00> : vector<2x8x8xf32>
    %73 = tpu.matmul %72, %59, %cst_20 {dimension_numbers = #tpu.dot_dimension_numbers<[2], [1], [1], [2], [0, 0, 0, 1, 1, 2], [0], [0]>} : vector<2x8x8xf32>, vector<2x8x8xf32>, vector<2x8x8xf32> -> vector<2x8x8xf32>
    "tpu.trace_stop"() : () -> ()
    %74 = vector.shape_cast %73 : vector<2x8x8xf32> to vector<16x8xf32>
    %75 = vector.extract_strided_slice %6 {offsets = [8, 0], sizes = [8, 32], strides = [1, 1]} : vector<32x32xf32> to vector<8x32xf32>
    %cst_21 = arith.constant dense<0.000000e+00> : vector<16x32xf32>
    %76 = tpu.matmul %74, %75, %cst_21 {dimension_numbers = #tpu.dot_dimension_numbers<[1], [0], [0], [1], [0, 0, 1, 1], [], []>} : vector<16x8xf32>, vector<8x32xf32>, vector<16x32xf32> -> vector<16x32xf32>
    %77 = arith.addf %56, %76 : vector<16x32xf32>
    %78 = vector.extract_strided_slice %32 {offsets = [0, 0, 16], sizes = [2, 8, 8], strides = [1, 1, 1]} : vector<2x8x32xf32> to vector<2x8x8xf32>
    %79 = vector.extract_strided_slice %33 {offsets = [0, 0, 16], sizes = [2, 8, 8], strides = [1, 1, 1]} : vector<2x8x32xf32> to vector<2x8x8xf32>
    %80 = vector.extract_strided_slice %34 {offsets = [0, 0, 16], sizes = [2, 8, 8], strides = [1, 1, 1]} : vector<2x8x32xf32> to vector<2x8x8xf32>
    "tpu.trace_start"() <{level = 10 : i32, message = "bqd,bkd->bqk"}> : () -> ()
    %cst_22 = arith.constant dense<0.000000e+00> : vector<2x8x8xf32>
    %81 = tpu.matmul %78, %79, %cst_22 {dimension_numbers = #tpu.dot_dimension_numbers<[2], [2], [1], [1], [0, 0, 0, 1, 1, 1], [0], [0]>} : vector<2x8x8xf32>, vector<2x8x8xf32>, vector<2x8x8xf32> -> vector<2x8x8xf32>
    "tpu.trace_stop"() : () -> ()
    %cst_23 = arith.constant 0.353553385 : f32
    %82 = vector.broadcast %cst_23 : f32 to vector<2x8x8xf32>
    %83 = arith.mulf %81, %82 : vector<2x8x8xf32>
    %cst_24 = arith.constant dense<0xFF800000> : vector<2x8xf32>
    %84 = vector.multi_reduction <maximumf>, %83, %cst_24 [2] : vector<2x8x8xf32> to vector<2x8xf32>
    %85 = vector.shape_cast %84 : vector<2x8xf32> to vector<2x8x1xf32>
    %86 = vector.broadcast %85 : vector<2x8x1xf32> to vector<2x8x8xf32>
    %87 = arith.subf %83, %86 : vector<2x8x8xf32>
    %88 = math.exp %87 : vector<2x8x8xf32>
    %cst_25 = arith.constant dense<0.000000e+00> : vector<2x8xf32>
    %89 = vector.multi_reduction <add>, %88, %cst_25 [2] : vector<2x8x8xf32> to vector<2x8xf32>
    %90 = vector.shape_cast %89 : vector<2x8xf32> to vector<2x8x1xf32>
    %91 = tpu.reciprocal %90 {approx = true} : vector<2x8x1xf32> -> vector<2x8x1xf32>
    %92 = vector.broadcast %91 : vector<2x8x1xf32> to vector<2x8x8xf32>
    %93 = arith.mulf %88, %92 : vector<2x8x8xf32>
    "tpu.trace_start"() <{level = 10 : i32, message = "bqk,bkd->bqd"}> : () -> ()
    %cst_26 = arith.constant dense<0.000000e+00> : vector<2x8x8xf32>
    %94 = tpu.matmul %93, %80, %cst_26 {dimension_numbers = #tpu.dot_dimension_numbers<[2], [1], [1], [2], [0, 0, 0, 1, 1, 2], [0], [0]>} : vector<2x8x8xf32>, vector<2x8x8xf32>, vector<2x8x8xf32> -> vector<2x8x8xf32>
    "tpu.trace_stop"() : () -> ()
    %95 = vector.shape_cast %94 : vector<2x8x8xf32> to vector<16x8xf32>
    %96 = vector.extract_strided_slice %6 {offsets = [16, 0], sizes = [8, 32], strides = [1, 1]} : vector<32x32xf32> to vector<8x32xf32>
    %cst_27 = arith.constant dense<0.000000e+00> : vector<16x32xf32>
    %97 = tpu.matmul %95, %96, %cst_27 {dimension_numbers = #tpu.dot_dimension_numbers<[1], [0], [0], [1], [0, 0, 1, 1], [], []>} : vector<16x8xf32>, vector<8x32xf32>, vector<16x32xf32> -> vector<16x32xf32>
    %98 = arith.addf %77, %97 : vector<16x32xf32>
    %99 = vector.extract_strided_slice %32 {offsets = [0, 0, 24], sizes = [2, 8, 8], strides = [1, 1, 1]} : vector<2x8x32xf32> to vector<2x8x8xf32>
    %100 = vector.extract_strided_slice %33 {offsets = [0, 0, 24], sizes = [2, 8, 8], strides = [1, 1, 1]} : vector<2x8x32xf32> to vector<2x8x8xf32>
    %101 = vector.extract_strided_slice %34 {offsets = [0, 0, 24], sizes = [2, 8, 8], strides = [1, 1, 1]} : vector<2x8x32xf32> to vector<2x8x8xf32>
    "tpu.trace_start"() <{level = 10 : i32, message = "bqd,bkd->bqk"}> : () -> ()
    %cst_28 = arith.constant dense<0.000000e+00> : vector<2x8x8xf32>
    %102 = tpu.matmul %99, %100, %cst_28 {dimension_numbers = #tpu.dot_dimension_numbers<[2], [2], [1], [1], [0, 0, 0, 1, 1, 1], [0], [0]>} : vector<2x8x8xf32>, vector<2x8x8xf32>, vector<2x8x8xf32> -> vector<2x8x8xf32>
    "tpu.trace_stop"() : () -> ()
    %cst_29 = arith.constant 0.353553385 : f32
    %103 = vector.broadcast %cst_29 : f32 to vector<2x8x8xf32>
    %104 = arith.mulf %102, %103 : vector<2x8x8xf32>
    %cst_30 = arith.constant dense<0xFF800000> : vector<2x8xf32>
    %105 = vector.multi_reduction <maximumf>, %104, %cst_30 [2] : vector<2x8x8xf32> to vector<2x8xf32>
    %106 = vector.shape_cast %105 : vector<2x8xf32> to vector<2x8x1xf32>
    %107 = vector.broadcast %106 : vector<2x8x1xf32> to vector<2x8x8xf32>
    %108 = arith.subf %104, %107 : vector<2x8x8xf32>
    %109 = math.exp %108 : vector<2x8x8xf32>
    %cst_31 = arith.constant dense<0.000000e+00> : vector<2x8xf32>
    %110 = vector.multi_reduction <add>, %109, %cst_31 [2] : vector<2x8x8xf32> to vector<2x8xf32>
    %111 = vector.shape_cast %110 : vector<2x8xf32> to vector<2x8x1xf32>
    %112 = tpu.reciprocal %111 {approx = true} : vector<2x8x1xf32> -> vector<2x8x1xf32>
    %113 = vector.broadcast %112 : vector<2x8x1xf32> to vector<2x8x8xf32>
    %114 = arith.mulf %109, %113 : vector<2x8x8xf32>
    "tpu.trace_start"() <{level = 10 : i32, message = "bqk,bkd->bqd"}> : () -> ()
    %cst_32 = arith.constant dense<0.000000e+00> : vector<2x8x8xf32>
    %115 = tpu.matmul %114, %101, %cst_32 {dimension_numbers = #tpu.dot_dimension_numbers<[2], [1], [1], [2], [0, 0, 0, 1, 1, 2], [0], [0]>} : vector<2x8x8xf32>, vector<2x8x8xf32>, vector<2x8x8xf32> -> vector<2x8x8xf32>
    "tpu.trace_stop"() : () -> ()
    %116 = vector.shape_cast %115 : vector<2x8x8xf32> to vector<16x8xf32>
    %117 = vector.extract_strided_slice %6 {offsets = [24, 0], sizes = [8, 32], strides = [1, 1]} : vector<32x32xf32> to vector<8x32xf32>
    %cst_33 = arith.constant dense<0.000000e+00> : vector<16x32xf32>
    %118 = tpu.matmul %116, %117, %cst_33 {dimension_numbers = #tpu.dot_dimension_numbers<[1], [0], [0], [1], [0, 0, 1, 1], [], []>} : vector<16x8xf32>, vector<8x32xf32>, vector<16x32xf32> -> vector<16x32xf32>
    %119 = arith.addf %98, %118 : vector<16x32xf32>
    %120 = vector.broadcast %9 : vector<1x32xf32> to vector<16x32xf32>
    %121 = arith.addf %119, %120 : vector<16x32xf32>
    %122 = arith.addf %0, %121 : vector<16x32xf32>
    %cst_34 = arith.constant dense<0.000000e+00> : vector<16xf32>
    %123 = vector.multi_reduction <add>, %122, %cst_34 [1] : vector<16x32xf32> to vector<16xf32>
    %124 = vector.shape_cast %123 : vector<16xf32> to vector<16x1xf32>
    %cst_35 = arith.constant 3.200000e+01 : f32
    %125 = vector.broadcast %cst_35 : f32 to vector<16x1xf32>
    %126 = arith.divf %124, %125 : vector<16x1xf32>
    %127 = vector.broadcast %126 : vector<16x1xf32> to vector<16x32xf32>
    %128 = arith.subf %122, %127 : vector<16x32xf32>
    %129 = arith.mulf %128, %128 : vector<16x32xf32>
    %cst_36 = arith.constant dense<0.000000e+00> : vector<16xf32>
    %130 = vector.multi_reduction <add>, %129, %cst_36 [1] : vector<16x32xf32> to vector<16xf32>
    %131 = vector.shape_cast %130 : vector<16xf32> to vector<16x1xf32>
    %cst_37 = arith.constant 3.200000e+01 : f32
    %132 = vector.broadcast %cst_37 : f32 to vector<16x1xf32>
    %133 = arith.divf %131, %132 : vector<16x1xf32>
    %134 = vector.broadcast %126 : vector<16x1xf32> to vector<16x32xf32>
    %135 = arith.subf %122, %134 : vector<16x32xf32>
    %cst_38 = arith.constant 9.99999974E-6 : f32
    %136 = vector.broadcast %cst_38 : f32 to vector<16x1xf32>
    %137 = arith.addf %133, %136 : vector<16x1xf32>
    %138 = math.rsqrt %137 : vector<16x1xf32>
    %139 = vector.broadcast %138 : vector<16x1xf32> to vector<16x32xf32>
    %140 = arith.mulf %135, %139 : vector<16x32xf32>
    %141 = vector.broadcast %10 : vector<1x32xf32> to vector<16x32xf32>
    %142 = arith.mulf %140, %141 : vector<16x32xf32>
    %143 = vector.broadcast %11 : vector<1x32xf32> to vector<16x32xf32>
    %144 = arith.addf %142, %143 : vector<16x32xf32>
    %cst_39 = arith.constant dense<0.000000e+00> : vector<16x64xf32>
    %145 = tpu.matmul %144, %7, %cst_39 {dimension_numbers = #tpu.dot_dimension_numbers<[1], [0], [0], [1], [0, 0, 1, 1], [], []>} : vector<16x32xf32>, vector<32x64xf32>, vector<16x64xf32> -> vector<16x64xf32>
    %146 = vector.broadcast %12 : vector<1x64xf32> to vector<16x64xf32>
    %147 = arith.addf %145, %146 : vector<16x64xf32>
    %cst_40 = arith.constant 0.000000e+00 : f32
    %148 = vector.broadcast %cst_40 : f32 to vector<16x64xf32>
    %149 = arith.maximumf %147, %148 : vector<16x64xf32>
    %cst_41 = arith.constant dense<0.000000e+00> : vector<16x32xf32>
    %150 = tpu.matmul %149, %3, %cst_41 {dimension_numbers = #tpu.dot_dimension_numbers<[1], [0], [0], [1], [0, 0, 1, 1], [], []>} : vector<16x64xf32>, vector<64x32xf32>, vector<16x32xf32> -> vector<16x32xf32>
    %151 = vector.broadcast %13 : vector<1x32xf32> to vector<16x32xf32>
    %152 = arith.addf %150, %151 : vector<16x32xf32>
    %153 = arith.addf %144, %152 : vector<16x32xf32>
    %cst_42 = arith.constant dense<0.000000e+00> : vector<16xf32>
    %154 = vector.multi_reduction <add>, %153, %cst_42 [1] : vector<16x32xf32> to vector<16xf32>
    %155 = vector.shape_cast %154 : vector<16xf32> to vector<16x1xf32>
    %cst_43 = arith.constant 3.200000e+01 : f32
    %156 = vector.broadcast %cst_43 : f32 to vector<16x1xf32>
    %157 = arith.divf %155, %156 : vector<16x1xf32>
    %158 = vector.broadcast %157 : vector<16x1xf32> to vector<16x32xf32>
    %159 = arith.subf %153, %158 : vector<16x32xf32>
    %160 = arith.mulf %159, %159 : vector<16x32xf32>
    %cst_44 = arith.constant dense<0.000000e+00> : vector<16xf32>
    %161 = vector.multi_reduction <add>, %160, %cst_44 [1] : vector<16x32xf32> to vector<16xf32>
    %162 = vector.shape_cast %161 : vector<16xf32> to vector<16x1xf32>
    %cst_45 = arith.constant 3.200000e+01 : f32
    %163 = vector.broadcast %cst_45 : f32 to vector<16x1xf32>
    %164 = arith.divf %162, %163 : vector<16x1xf32>
    %165 = vector.broadcast %157 : vector<16x1xf32> to vector<16x32xf32>
    %166 = arith.subf %153, %165 : vector<16x32xf32>
    %cst_46 = arith.constant 9.99999974E-6 : f32
    %167 = vector.broadcast %cst_46 : f32 to vector<16x1xf32>
    %168 = arith.addf %164, %167 : vector<16x1xf32>
    %169 = math.rsqrt %168 : vector<16x1xf32>
    %170 = vector.broadcast %169 : vector<16x1xf32> to vector<16x32xf32>
    %171 = arith.mulf %166, %170 : vector<16x32xf32>
    %172 = vector.broadcast %14 : vector<1x32xf32> to vector<16x32xf32>
    %173 = arith.mulf %171, %172 : vector<16x32xf32>
    %174 = vector.broadcast %15 : vector<1x32xf32> to vector<16x32xf32>
    %175 = arith.addf %173, %174 : vector<16x32xf32>
    %c0_47 = arith.constant 0 : index
    %c0_48 = arith.constant 0 : index
    %176 = vector.load %arg5[%c0_47, %c0_48] : memref<16x32xf32, #tpu.memory_space<vmem>>, vector<16x32xf32>
    tpu.vector_store %arg5[%c0_47, %c0_48], %175 {strides = array<i32>} : memref<16x32xf32, #tpu.memory_space<vmem>>, vector<16x32xf32>,
    return
  }
}

</mosaic_0001>

<bundles_post_ra>
// kernel: tpu_custom_call.1
= control target key start
LH: loop header
LB: loop body
LE: loop exit
PB: predicated region body
PF: predicated region fallthrough
CT: control target
= control target key end

     0   :  { %10 = vsyncpa [#allocation3], 0  ;;  %s2857_s0 = inlined_call_operand.vmem [shape: f32[16,32], index: 0, kind: input, shape index: {}]   ;;  %s2858_s1 = inlined_call_operand.vmem [shape: f32[16,64], index: 1, kind: input, shape index: {}]   ;;  %s2859_s2 = inlined_call_operand.vmem [shape: f32[32,256], index: 2, kind: input, shape index: {}]   ;;  %s2860_s3 = inlined_call_operand.vmem [shape: f32[64,32], index: 3, kind: input, shape index: {}]   ;;  %s2861_s4 = inlined_call_operand.hbm [shape: f32[8,160], index: 4, kind: input, shape index: {}]   ;;  %s2862_s5 = inlined_call_operand.hbm [shape: f32[16,32], index: 5, kind: output, shape index: {}]  }
   0x1   :  { %11 = vsyncpa [#allocation4], 0  ;;  %s2499_s18 = smov [#allocation2]  }
   0x2   :  { %s26_s19 = sshll.u32 %s2499_s18, 4  ;;  %s27_s19 = int_to_ptr.vmem [resolvable:$true] %s26_s19 }
   0x3   :  { %s2463_s20 = scalar_lea.vmem %s27_s19, 256  ;;  %p2468_p1 = scmp.lt.s32.totalorder %s27_s19, %s27_s19 }
   0x4   :  { %p2464_p0 = scmp.ne.s32.totalorder %s27_s19, %s2463_s20  ;;  %p2469_p2 = scmp.lt.s32.totalorder %s2463_s20, %s2463_s20 }
   0x6   :  { %p2470_p3 = por %p2469_p2, %p2468_p1 }
   0x8   :  { %p2471_p4 = pnand %p2470_p3, %p2464_p0 }
   0xa   :  { %2474 = shalt.err (!%p2471_p4)
}
   0xb   :  { %29 = dma.hbm_to_vmem [thread:$0]  %s2861_s4, 256, %s27_s19, [#allocation3]  }
   0xc   :  { %2495 = dma.done.wait [#allocation3], 256  }
   0xd   :  { %2496 = vsyncadd [#allocation3], 4294967040  ;;  %v2500_v0 = vmov 0.0   ;;  %v2555_v1 = vld [vmem:[%s2859_s2 + $0x38] sm:$0xff]  ;;  %v43_v2 = vld [vmem:[%s2859_s2 + $0x30] sm:$0xff]  ;;  %vm63_vm0 = vcmask 261120   ;;  %v55_v13 = vlaneseq }
   0xe   :  { %134 = vmatprep.mubr.f32.mxu0 %v2500_v0  ;;  %140 = vmatprep.mubr.f32.mxu1 %v2500_v0  ;;  %v2563_v3 = vld [vmem:[%s2859_s2 + $0x28] sm:$0xff]  ;;  %v41_v4 = vld [vmem:[%s2859_s2 + $0x20] sm:$0xff]  ;;  %v2573_v5 = vld [vmem:[%s2859_s2 + $0x18] sm:$0xff]  ;;  %s2501_s18 = smov 96   ;;  %s2503_s21 = smov 64   ;;  %vm2504_vm1 = vmmov 0  }
   0xf   :  { %94 = vmatprep.subr.mxu0 %v2555_v1  ;;  %2389 = vmatprep.subr.mxu1 %v2555_v1  ;;  %v39_v6 = vld [vmem:[%s2859_s2 + $0x10] sm:$0xff]  ;;  %v2583_v7 = vld [vmem:[%s2859_s2 + $0x8] sm:$0xff]  ;;  %v37_v8 = vld [vmem:[%s2859_s2] sm:$0xff]  ;;  %v2618_v14 = vshrl.u32 %v55_v13, 7  ;;  %vm198_vm2 = vcmask 64512   ;;  %s2506_s22 = smov 120  }
  0x10   :  { %95 = vmatpush1.msra.mxu0 %v43_v2  ;;  %2393 = vmatpush1.msra.mxu1 %v43_v2  ;;  %v2593_v9 = vld [vmem:[%s2857_s0] sm:$0xff]  ;;  %v2598_v10 = vld [vmem:[%s2857_s0 + $0x8] sm:$0xff]  ;;  %s2502_s0 = smov 32   ;;  %s2507_s23 = smov 56   ;;  %vm2020_vm3 = vcmask 523264  }
  0x11   :  { %96 = vmatprep.subr.mxu0 %v2563_v3  ;;  %2390 = vmatprep.subr.mxu1 %v2563_v3  ;;  %v35_v11 = vld [vmem:[%s2858_s1] sm:$0xff]  ;;  %v36_v12 = vld [vmem:[%s2858_s1 + $0x8] sm:$0xff]  ;;  %v57_v15 = vsub.s32 0, %v2618_v14  ;;  %s2505_s1 = smov 88   ;;  %s2508_s24 = smov 80  }
  0x12   :  { %97 = vmatpush1.msra.mxu0 %v41_v4  ;;  %2394 = vmatpush1.msra.mxu1 %v41_v4  ;;  %v2621_v16 = vld [vmem:[#allocation2] sm:$0xff]  ;;  %v54_v17 = vld [vmem:[#allocation2 + $0x8] sm:$0xff]  ;;  %s2509_s25 = smov 112   ;;  %s2510_s26 = smov 48  }
  0x13   :  { %98 = vmatprep.subr.mxu0 %v2573_v5  ;;  %2391 = vmatprep.subr.mxu1 %v2573_v5  ;;  %v58_v19 = vrot.slane %v2621_v16, %v57_v15  ;;  %v62_v20 = vrot.slane %v54_v17, %v57_v15  ;;  %s2511_s27 = smov 72   ;;  %s2512_s28 = smov 104  }
  0x14   :  { %99 = vmatpush1.msra.mxu0 %v39_v6  ;;  %2395 = vmatpush1.msra.mxu1 %v39_v6  ;;  %s2513_s4 = smov 40  }
  0x15   :  { %100 = vmatprep.subr.mxu0 %v2583_v7  ;;  %2392 = vmatprep.subr.mxu1 %v2583_v7 }
  0x16   :  { %101 = vmatpush1.msra.mxu0 %v37_v8  ;;  %2396 = vmatpush1.msra.mxu1 %v37_v8 }
  0x17   :  { %2161 = vmatmul.mubr.msk.f32.vlgmr.msra.gmra.mxu0 %vm63_vm0, %v2593_v9  ;;  %2162 = vmatmul.mubr.msk.f32.vlgmr.msra.gmra.mxu1 %vm63_vm0, %v2598_v10 }
  0x18   :  { %177 = vrot.lane.b32.xlu0 %v35_v11, %s2501_s18  ;;  %169 = vrot.lane.b32.xlu1 %v35_v11, %s2502_s0 }
  0x19   :  { %2259 = vmatprep.subr.mxu1 %v2500_v0  ;;  %2274 = vmatprep.subr.mxu0 %v2500_v0 }
  0x1a   :  { %2261 = vmatprep.mubr.msk.f32.mxu1 %vm2504_vm1, %v2500_v0  ;;  %2276 = vmatprep.mubr.msk.f32.mxu0 %vm2504_vm1, %v2500_v0 }
  0x1c   :  { %179 = vrot.lane.b32.xlu0 %v36_v12, %s2501_s18 }
  0x20   :  { %151 = vrot.lane.b32.xlu0 %v35_v11, %s2503_s21 }
  0x8a   :  { %v178_v18 = vpop.permute.xlu0 %177  ;;  %v170_v34 = vpop.permute.xlu1 %169 }
  0x8e   :  { %v180_v28 = vpop.permute.xlu0 %179 }
  0x92   :  { %v152_v32 = vpop.permute.xlu0 %151 }
  0xd7   :  { %v136_v21 = vpop.f32.mrf.mxu0  ;;  %v142_v22 = vpop.f32.mrf.mxu1 }
  0xd8   :  { %v2624_v23 = vadd.f32 %v142_v22, %v58_v19  ;;  %v2629_v31 = vadd.f32 %v136_v21, %v58_v19 }
  0xd9   :  { %v138_v24 = vpop.f32.mrf.mxu0  ;;  %v144_v25 = vpop.f32.mrf.mxu1 }
  0xda   :  { %v139_v26 = vadd.f32 %v138_v24, %v62_v20  ;;  %v145_v27 = vadd.f32 %v144_v25, %v62_v20  ;;  %v157_v33 = vmul.f32 %v152_v32, %v2629_v31  ;;  %v175_v35 = vmul.f32 %v170_v34, %v2629_v31 }
  0xdb   :  { %v147_v45 = vmul.f32 %v2629_v31, %v35_v11  ;;  %v148_v49 = vmul.f32 %v2624_v23, %v36_v12 }
  0xdc   :  { %v183_v29 = vmul.f32 %v178_v18, %v139_v26  ;;  %v184_v30 = vmul.f32 %v180_v28, %v145_v27 }
  0xde   :  { %187 = vrot.lane.b32.xlu1 %v183_v29, %s2502_s0  ;;  %189 = vrot.lane.b32.xlu0 %v184_v30, %s2502_s0 }
  0xe2   :  { %171 = vrot.lane.b32.xlu1 %v36_v12, %s2502_s0 }
  0xe6   :  { %153 = vrot.lane.b32.xlu1 %v36_v12, %s2503_s21 }
  0xea   :  { %161 = vrot.lane.b32.xlu1 %v157_v33, %s2502_s0 }
 0x150   :  { %v188_v36 = vpop.permute.xlu1 %187  ;;  %v190_v38 = vpop.permute.xlu0 %189 }
 0x151   :  { %v2639_v37 = vadd.f32 %v188_v36, %v175_v35 }
 0x153   :  { %196 = vrot.lane.b32.xlu0 %v2639_v37, %s2501_s18 }
 0x154   :  { %v172_v39 = vpop.permute.xlu1 %171 }
 0x155   :  { %v176_v40 = vmul.f32 %v172_v39, %v2624_v23 }
 0x157   :  { %v2644_v41 = vadd.f32 %v190_v38, %v176_v40 }
 0x158   :  { %v154_v42 = vpop.permute.xlu1 %153 }
 0x159   :  { %v158_v43 = vmul.f32 %v154_v42, %v2624_v23  ;;  %275 = vrot.lane.b32.xlu0 %v2644_v41, %s2501_s18 }
 0x15b   :  { %163 = vrot.lane.b32.xlu1 %v158_v43, %s2502_s0 }
 0x15c   :  { %v162_v44 = vpop.permute.xlu1 %161 }
 0x15d   :  { %v2652_v47 = vadd.f32 %v162_v44, %v147_v45 }
 0x1c5   :  { %v197_v46 = vpop.permute.xlu0 %196 }
 0x1c6   :  { %2260 = vmatpush3.xpose.msk.msra.mxu1 %vm198_vm2, %v197_v46 }
 0x1c7   :  { %2264 = vmatprep.subr.mxu1 %v2500_v0 }
 0x1c9   :  { %2262 = vmatmul.mubr.msk.f32.vlgmr.msra.gmra.mxu1 %vm198_vm2, %v2652_v47 }
 0x1ca   :  { %2266 = vmatprep.mubr.msk.f32.mxu1 %vm2504_vm1, %v2500_v0 }
 0x1cb   :  { %v276_v48 = vpop.permute.xlu0 %275 }
 0x1cc   :  { %2265 = vmatpush3.xpose.msk.msra.mxu1 %vm198_vm2, %v276_v48 }
 0x1cd   :  { %v164_v50 = vpop.permute.xlu1 %163  ;;  %2269 = vmatprep.subr.mxu1 %v2500_v0 }
 0x1ce   :  { %v2662_v51 = vadd.f32 %v164_v50, %v148_v49 }
 0x1d0   :  { %2267 = vmatmul.mubr.msk.f32.vlgmr.msra.gmra.mxu1 %vm198_vm2, %v2662_v51 }
 0x1d1   :  { %2271 = vmatprep.mubr.msk.f32.mxu1 %vm2504_vm1, %v2500_v0 }
 0x289   :  { %v270_v52 = vpop.f32.mrf.mxu1 }
 0x28a   :  { %v352_v53 = vmul.f32 0.35355338, %v270_v52 }
 0x28b   :  { %v2263_v54 = vpop.f32.mrf.mxu1 }
 0x28c   :  { %v354_v55 = vsel %vm198_vm2, %v352_v53, -inf }
 0x28d   :  { %355 = vmax.xlane.f32.xlu0 %v354_v55 }
 0x290   :  { %v348_v56 = vpop.f32.mrf.mxu1 }
 0x291   :  { %v353_v57 = vmul.f32 0.35355338, %v348_v56 }
 0x292   :  { %v2268_v58 = vpop.f32.mrf.mxu1 }
 0x293   :  { %v357_v59 = vsel %vm198_vm2, %v353_v57, -inf }
 0x294   :  { %358 = vmax.xlane.f32.xlu1 %v357_v59 }
 0x2a3   :  { %454 = vrot.lane.b32.xlu0 %v2624_v23, %s2503_s21 }
 0x2a5   :  { %377 = vrot.lane.b32.xlu1 %v2629_v31, %s2503_s21 }
 0x2a9   :  { %532 = vrot.lane.b32.xlu1 %v2639_v37, %s2505_s1 }
 0x2ad   :  { %610 = vrot.lane.b32.xlu1 %v2644_v41, %s2505_s1 }
 0x2b1   :  { %608 = vrot.lane.b32.xlu1 %v2662_v51, %s2506_s22 }
 0x316   :  { %v356_v60 = vpop.xlane.xlu0 %355 }
 0x317   :  { %v360_v61 = vsub.f32 %v352_v53, %v356_v60 }
 0x319   :  { %v362_v62 = vmul.f32 1.442695, %v360_v61 }
 0x31a   :  { %v455_v63 = vpop.permute.xlu0 %454 }
 0x31b   :  { %2415 = vpow2.f32 %v362_v62  ;;  %2275 = vmatpush3.msra.mxu0 %v455_v63 }
 0x31c   :  { %2284 = vmatprep.subr.mxu0 %v2500_v0 }
 0x31d   :  { %v359_v2 = vpop.xlane.xlu1 %358 }
 0x31e   :  { %v361_v4 = vsub.f32 %v353_v57, %v359_v2 }
 0x320   :  { %v364_v6 = vmul.f32 1.442695, %v361_v4 }
 0x321   :  { %v378_v8 = vpop.permute.xlu1 %377 }
 0x322   :  { %2417 = vpow2.f32 %v364_v6  ;;  %2270 = vmatpush3.msra.mxu1 %v378_v8 }
 0x323   :  { %2279 = vmatprep.subr.mxu1 %v2500_v0 }
 0x325   :  { %v533_v20 = vpop.permute.xlu1 %532 }
 0x328   :  { %v2416_v11 = vpop.eup %2415 }
 0x329   :  { %v366_v12 = vsel %vm198_vm2, %v2416_v11, 0.0  ;;  %v611_v25 = vpop.permute.xlu1 %610 }
 0x32a   :  { %367 = vadd.xlane.f32.xlu0 %v366_v12 }
 0x32d   :  { %v609_v27 = vpop.permute.xlu1 %608 }
 0x32f   :  { %v2418_v13 = vpop.eup %2417 }
 0x330   :  { %v369_v15 = vsel %vm198_vm2, %v2418_v13, 0.0 }
 0x331   :  { %370 = vadd.xlane.f32.xlu0 %v369_v15 }
 0x347   :  { %530 = vrot.lane.b32.xlu0 %v2652_v47, %s2506_s22 }
 0x3b3   :  { %v368_v17 = vpop.xlane.xlu0 %367 }
 0x3b4   :  { %2419 = vrcp.f32 %v368_v17 }
 0x3ba   :  { %v371_v18 = vpop.xlane.xlu0 %370 }
 0x3bb   :  { %2421 = vrcp.f32 %v371_v18 }
 0x3be   :  { %v531_v22 = vpop.permute.xlu0 %530 }
 0x3c1   :  { %v2420_v19 = vpop.eup %2419 }
 0x3c2   :  { %v374_v21 = vmul.f32 %v2420_v19, %v2416_v11 }
 0x3c4   :  { %2272 = vmatmul.mubr.msk.f32.vlgmr.msra.gmra.mxu1 %vm198_vm2, %v374_v21 }
 0x3c5   :  { %2280 = vmatpush3.xpose.msk.msra.mxu1 %vm198_vm2, %v533_v20  ;;  %2281 = vmatprep.mubr.msk.f32.mxu1 %vm2504_vm1, %v2500_v0 }
 0x3c6   :  { %2289 = vmatprep.subr.mxu1 %v2500_v0 }
 0x3c8   :  { %v2422_v24 = vpop.eup %2421  ;;  %2282 = vmatmul.mubr.msk.f32.vlgmr.msra.gmra.mxu1 %vm198_vm2, %v531_v22 }
 0x3c9   :  { %v375_v26 = vmul.f32 %v2422_v24, %v2418_v13  ;;  %2291 = vmatprep.mubr.msk.f32.mxu1 %vm2504_vm1, %v2500_v0 }
 0x3cb   :  { %2277 = vmatmul.mubr.msk.f32.vlgmr.msra.gmra.mxu0 %vm198_vm2, %v375_v26 }
 0x3cc   :  { %2285 = vmatpush3.xpose.msk.msra.mxu0 %vm198_vm2, %v611_v25  ;;  %2286 = vmatprep.mubr.msk.f32.mxu0 %vm2504_vm1, %v2500_v0 }
 0x3cd   :  { %2294 = vmatprep.subr.mxu0 %v2500_v0 }
 0x3cf   :  { %2287 = vmatmul.mubr.msk.f32.vlgmr.msra.gmra.mxu0 %vm198_vm2, %v609_v27 }
 0x3d0   :  { %2296 = vmatprep.mubr.msk.f32.mxu0 %vm2504_vm1, %v2500_v0 }
 0x484   :  { %v449_v28 = vpop.f32.mrf.mxu1 }
 0x486   :  { %v2273_v29 = vpop.f32.mrf.mxu1 }
 0x488   :  { %v604_v30 = vpop.f32.mrf.mxu1 }
 0x489   :  { %v686_v32 = vmul.f32 0.35355338, %v604_v30 }
 0x48a   :  { %v2283_v33 = vpop.f32.mrf.mxu1 }
 0x48b   :  { %v526_v34 = vpop.f32.mrf.mxu0  ;;  %v688_v35 = vsel %vm198_vm2, %v686_v32, -inf }
 0x48c   :  { %689 = vmax.xlane.f32.xlu0 %v688_v35 }
 0x48d   :  { %v2278_v36 = vpop.f32.mrf.mxu0 }
 0x48f   :  { %v682_v38 = vpop.f32.mrf.mxu0 }
 0x490   :  { %v687_v39 = vmul.f32 0.35355338, %v682_v38 }
 0x491   :  { %v2288_v40 = vpop.f32.mrf.mxu0 }
 0x492   :  { %v691_v42 = vsel %vm198_vm2, %v687_v39, -inf }
 0x493   :  { %692 = vmax.xlane.f32.xlu1 %v691_v42 }
 0x4a4   :  { %710 = vrot.lane.b32.xlu1 %v2629_v31, %s2507_s23 }
 0x4a8   :  { %863 = vrot.lane.b32.xlu1 %v2573_v5, %s2501_s18 }
 0x4ac   :  { %948 = vrot.lane.b32.xlu1 %v2583_v7, %s2501_s18 }
 0x4b0   :  { %1112 = vrot.lane.b32.xlu1 %v2644_v41, %s2508_s24 }
 0x4b4   :  { %1110 = vrot.lane.b32.xlu1 %v2662_v51, %s2509_s25 }
 0x515   :  { %v690_v43 = vpop.xlane.xlu0 %689 }
 0x516   :  { %v694_v44 = vsub.f32 %v686_v32, %v690_v43 }
 0x518   :  { %v696_v45 = vmul.f32 1.442695, %v694_v44 }
 0x51a   :  { %2423 = vpow2.f32 %v696_v45 }
 0x51c   :  { %v693_v46 = vpop.xlane.xlu1 %692 }
 0x51d   :  { %v695_v48 = vsub.f32 %v687_v39, %v693_v46 }
 0x51f   :  { %v698_v49 = vmul.f32 1.442695, %v695_v48 }
 0x520   :  { %v711_v50 = vpop.permute.xlu1 %710 }
 0x521   :  { %2425 = vpow2.f32 %v698_v49  ;;  %2290 = vmatpush3.msra.mxu1 %v711_v50 }
 0x524   :  { %v864_v52 = vpop.permute.xlu1 %863 }
 0x525   :  { %2299 = vmatprep.subr.mxu1 %v864_v52 }
 0x527   :  { %v2424_v53 = vpop.eup %2423 }
 0x528   :  { %v700_v54 = vsel %vm198_vm2, %v2424_v53, 0.0  ;;  %v949_v60 = vpop.permute.xlu1 %948 }
 0x529   :  { %701 = vadd.xlane.f32.xlu0 %v700_v54 }
 0x52c   :  { %v1113_v4 = vpop.permute.xlu1 %1112 }
 0x52e   :  { %v2426_v55 = vpop.eup %2425 }
 0x52f   :  { %v703_v56 = vsel %vm198_vm2, %v2426_v55, 0.0 }
 0x530   :  { %704 = vadd.xlane.f32.xlu0 %v703_v56  ;;  %v1111_v6 = vpop.permute.xlu1 %1110 }
 0x546   :  { %786 = vrot.lane.b32.xlu0 %v2624_v23, %s2507_s23 }
 0x54a   :  { %1034 = vrot.lane.b32.xlu0 %v2639_v37, %s2508_s24 }
 0x54e   :  { %1032 = vrot.lane.b32.xlu0 %v2652_v47, %s2509_s25 }
 0x5b2   :  { %v702_v57 = vpop.xlane.xlu0 %701 }
 0x5b3   :  { %2427 = vrcp.f32 %v702_v57 }
 0x5b9   :  { %v705_v58 = vpop.xlane.xlu0 %704 }
 0x5ba   :  { %2429 = vrcp.f32 %v705_v58 }
 0x5bd   :  { %v787_v59 = vpop.permute.xlu0 %786 }
 0x5be   :  { %2295 = vmatpush3.msra.mxu0 %v787_v59 }
 0x5bf   :  { %2304 = vmatprep.subr.mxu0 %v949_v60 }
 0x5c0   :  { %v2428_v61 = vpop.eup %2427 }
 0x5c1   :  { %v708_v62 = vmul.f32 %v2428_v61, %v2424_v53  ;;  %v1035_v12 = vpop.permute.xlu0 %1034 }
 0x5c3   :  { %2292 = vmatmul.mubr.msk.f32.vlgmr.msra.gmra.mxu1 %vm198_vm2, %v708_v62 }
 0x5c4   :  { %2300 = vmatpush3.msra.mxu1 %v864_v52 }
 0x5c5   :  { %2309 = vmatprep.subr.mxu1 %v2500_v0  ;;  %v1033_v17 = vpop.permute.xlu0 %1032 }
 0x5c7   :  { %v2430_v63 = vpop.eup %2429 }
 0x5c8   :  { %v709_v2 = vmul.f32 %v2430_v63, %v2426_v55 }
 0x5ca   :  { %2297 = vmatmul.mubr.msk.f32.vlgmr.msra.gmra.mxu0 %vm198_vm2, %v709_v2 }
 0x5cb   :  { %2306 = vmatprep.mubr.msk.f32.mxu0 %vm198_vm2, %v449_v28  ;;  %2305 = vmatpush3.msra.mxu0 %v949_v60 }
 0x5cc   :  { %2314 = vmatprep.subr.mxu0 %v2500_v0 }
 0x5ce   :  { %2307 = vmatmul.mubr.msk.f32.vlgmr.msra.gmra.mxu0 %vm198_vm2, %v526_v34 }
 0x5cf   :  { %2315 = vmatpush3.xpose.msk.msra.mxu0 %vm198_vm2, %v1113_v4  ;;  %2316 = vmatprep.mubr.msk.f32.mxu0 %vm2504_vm1, %v2500_v0 }
 0x5d0   :  { %2324 = vmatprep.subr.mxu0 %v2500_v0 }
 0x5d2   :  { %2317 = vmatmul.mubr.msk.f32.vlgmr.msra.gmra.mxu0 %vm198_vm2, %v1111_v6 }
 0x5d3   :  { %2326 = vmatprep.mubr.msk.f32.mxu0 %vm2504_vm1, %v2500_v0 }
 0x683   :  { %v782_v8 = vpop.f32.mrf.mxu1 }
 0x684   :  { %2301 = vmatprep.mubr.msk.f32.mxu1 %vm198_vm2, %v782_v8 }
 0x685   :  { %v2293_v11 = vpop.f32.mrf.mxu1 }
 0x68a   :  { %v858_v13 = vpop.f32.mrf.mxu0 }
 0x68b   :  { %2302 = vmatmul.mubr.msk.f32.vlgmr.msra.gmra.mxu1 %vm198_vm2, %v858_v13 }
 0x68c   :  { %2310 = vmatpush3.xpose.msk.msra.mxu1 %vm198_vm2, %v1035_v12  ;;  %v2298_v15 = vpop.f32.mrf.mxu0  ;;  %2311 = vmatprep.mubr.msk.f32.mxu1 %vm2504_vm1, %v2500_v0 }
 0x68d   :  { %2319 = vmatprep.subr.mxu1 %v2500_v0 }
 0x68e   :  { %v2731_v18 = vpop.f32.mrf.mxu0 }
 0x68f   :  { %2312 = vmatmul.mubr.msk.f32.vlgmr.msra.gmra.mxu1 %vm198_vm2, %v1033_v17 }
 0x690   :  { %v2734_v19 = vpop.f32.mrf.mxu0  ;;  %2321 = vmatprep.mubr.msk.f32.mxu1 %vm2504_vm1, %v2500_v0 }
 0x692   :  { %v1184_v20 = vpop.f32.mrf.mxu0 }
 0x693   :  { %v1189_v21 = vmul.f32 0.35355338, %v1184_v20 }
 0x694   :  { %v2318_v22 = vpop.f32.mrf.mxu0 }
 0x695   :  { %v1193_v24 = vsel %vm198_vm2, %v1189_v21, -inf }
 0x696   :  { %1194 = vmax.xlane.f32.xlu1 %v1193_v24 }
 0x6a7   :  { %1212 = vrot.lane.b32.xlu1 %v2629_v31, %s2510_s26 }
 0x6ab   :  { %1365 = vrot.lane.b32.xlu1 %v2563_v3, %s2501_s18 }
 0x6af   :  { %1453 = vrot.lane.b32.xlu1 %v2639_v37, %s2511_s27 }
 0x6b3   :  { %1451 = vrot.lane.b32.xlu1 %v2652_v47, %s2512_s28 }
 0x71f   :  { %v1195_v25 = vpop.xlane.xlu1 %1194 }
 0x720   :  { %v1197_v28 = vsub.f32 %v1189_v21, %v1195_v25 }
 0x722   :  { %v1200_v29 = vmul.f32 1.442695, %v1197_v28 }
 0x723   :  { %v1213_v26 = vpop.permute.xlu1 %1212 }
 0x724   :  { %2320 = vmatpush3.msra.mxu1 %v1213_v26  ;;  %2431 = vpow2.f32 %v1200_v29 }
 0x727   :  { %v1366_v27 = vpop.permute.xlu1 %1365 }
 0x728   :  { %2329 = vmatprep.subr.mxu1 %v1366_v27 }
 0x72b   :  { %v1454_v48 = vpop.permute.xlu1 %1453 }
 0x731   :  { %v2432_v36 = vpop.eup %2431 }
 0x732   :  { %v1205_v47 = vsel %vm198_vm2, %v2432_v36, 0.0 }
 0x74b   :  { %v2746_v30 = vpop.f32.mrf.mxu1 }
 0x74c   :  { %v1029_v6 = vadd.f32 %v2731_v18, %v2746_v30 }
 0x74d   :  { %v2748_v32 = vpop.f32.mrf.mxu1 }
 0x74e   :  { %v1024_v11 = vadd.f32 %v2734_v19, %v2748_v32 }
 0x74f   :  { %v1106_v33 = vpop.f32.mrf.mxu1 }
 0x750   :  { %v1188_v34 = vmul.f32 0.35355338, %v1106_v33 }
 0x751   :  { %v2313_v35 = vpop.f32.mrf.mxu1 }
 0x752   :  { %v1190_v37 = vsel %vm198_vm2, %v1188_v34, -inf }
 0x753   :  { %1191 = vmax.xlane.f32.xlu0 %v1190_v37 }
 0x757   :  { %1206 = vadd.xlane.f32.xlu0 %v1205_v47 }
 0x7dc   :  { %v1192_v38 = vpop.xlane.xlu0 %1191 }
 0x7dd   :  { %v1196_v39 = vsub.f32 %v1188_v34, %v1192_v38 }
 0x7df   :  { %v1198_v40 = vmul.f32 1.442695, %v1196_v39  ;;  %v1872_v39 = vsub.s32 1, %v2618_v14 }
 0x7e0   :  { %v1207_v44 = vpop.xlane.xlu0 %1206 }
 0x7e1   :  { %2433 = vpow2.f32 %v1198_v40  ;;  %v1873_v40 = vrot.slane %v2621_v16, %v1872_v39 }
 0x7e2   :  { %2435 = vrcp.f32 %v1207_v44 }
 0x7ee   :  { %v2434_v42 = vpop.eup %2433 }
 0x7ef   :  { %v1202_v43 = vsel %vm198_vm2, %v2434_v42, 0.0  ;;  %v2436_v46 = vpop.eup %2435 }
 0x7f0   :  { %1203 = vadd.xlane.f32.xlu0 %v1202_v43  ;;  %v1211_v50 = vmul.f32 %v2436_v46, %v2432_v36 }
 0x806   :  { %1288 = vrot.lane.b32.xlu0 %v2624_v23, %s2510_s26 }
 0x80a   :  { %1531 = vrot.lane.b32.xlu0 %v2644_v41, %s2511_s27  ;;  %v1452_v41 = vpop.permute.xlu1 %1451 }
 0x80e   :  { %1529 = vrot.lane.b32.xlu0 %v2662_v51, %s2512_s28 }
 0x879   :  { %v1204_v45 = vpop.xlane.xlu0 %1203 }
 0x87a   :  { %2437 = vrcp.f32 %v1204_v45 }
 0x87d   :  { %v1289_v49 = vpop.permute.xlu0 %1288 }
 0x87e   :  { %2325 = vmatpush3.msra.mxu0 %v1289_v49 }
 0x87f   :  { %2327 = vmatmul.mubr.msk.f32.vlgmr.msra.gmra.mxu0 %vm198_vm2, %v1211_v50  ;;  %2334 = vmatprep.subr.mxu0 %v2500_v0 }
 0x880   :  { %2335 = vmatpush3.xpose.msk.msra.mxu0 %vm198_vm2, %v1454_v48  ;;  %2336 = vmatprep.mubr.msk.f32.mxu0 %vm2504_vm1, %v2500_v0 }
 0x881   :  { %2344 = vmatprep.subr.mxu0 %v2500_v0  ;;  %v1532_v59 = vpop.permute.xlu0 %1531 }
 0x883   :  { %2337 = vmatmul.mubr.msk.f32.vlgmr.msra.gmra.mxu0 %vm198_vm2, %v1452_v41 }
 0x884   :  { %2346 = vmatprep.mubr.msk.f32.mxu0 %vm2504_vm1, %v2500_v0 }
 0x885   :  { %v1530_v62 = vpop.permute.xlu0 %1529 }
 0x887   :  { %v2438_v51 = vpop.eup %2437 }
 0x888   :  { %v1210_v52 = vmul.f32 %v2438_v51, %v2434_v42 }
 0x88a   :  { %2322 = vmatmul.mubr.msk.f32.vlgmr.msra.gmra.mxu1 %vm198_vm2, %v1210_v52 }
 0x88b   :  { %2330 = vmatpush3.msra.mxu1 %v1366_v27 }
 0x88c   :  { %2339 = vmatprep.subr.mxu1 %v2500_v0 }
 0x93f   :  { %v1360_v53 = vpop.f32.mrf.mxu0 }
 0x941   :  { %v2328_v54 = vpop.f32.mrf.mxu0 }
 0x943   :  { %v1525_v55 = vpop.f32.mrf.mxu0 }
 0x944   :  { %v1607_v56 = vmul.f32 0.35355338, %v1525_v55 }
 0x945   :  { %v2338_v57 = vpop.f32.mrf.mxu0 }
 0x946   :  { %v1609_v58 = vsel %vm198_vm2, %v1607_v56, -inf }
 0x947   :  { %1610 = vmax.xlane.f32.xlu1 %v1609_v58 }
 0x94a   :  { %v1284_v60 = vpop.f32.mrf.mxu1 }
 0x94b   :  { %2331 = vmatprep.mubr.msk.f32.mxu1 %vm198_vm2, %v1284_v60  ;;  %v50_v60 = vld [vmem:[%s2860_s3 + $0x28] sm:$0xff] }
 0x94c   :  { %v2323_v61 = vpop.f32.mrf.mxu1  ;;  %2332 = vmatmul.mubr.msk.f32.vlgmr.msra.gmra.mxu1 %vm198_vm2, %v1360_v53 }
 0x94d   :  { %2340 = vmatpush3.xpose.msk.msra.mxu1 %vm198_vm2, %v1532_v59  ;;  %2341 = vmatprep.mubr.msk.f32.mxu1 %vm2504_vm1, %v2500_v0 }
 0x94e   :  { %2349 = vmatprep.subr.mxu1 %v2500_v0 }
 0x950   :  { %2342 = vmatmul.mubr.msk.f32.vlgmr.msra.gmra.mxu1 %vm198_vm2, %v1530_v62 }
 0x951   :  { %2351 = vmatprep.mubr.msk.f32.mxu1 %vm2504_vm1, %v2500_v0 }
 0x9d0   :  { %v1611_v63 = vpop.xlane.xlu1 %1610 }
 0x9d1   :  { %v1615_v2 = vsub.f32 %v1607_v56, %v1611_v63 }
 0x9d3   :  { %v1617_v4 = vmul.f32 1.442695, %v1615_v2 }
 0x9d5   :  { %2439 = vpow2.f32 %v1617_v4 }
 0x9e2   :  { %v2440_v0 = vpop.eup %2439 }
 0x9e3   :  { %v1621_v24 = vsel %vm198_vm2, %v2440_v0, 0.0 }
 0xa0c   :  { %v2333_v8 = vpop.f32.mrf.mxu1 }
 0xa0d   :  { %v1450_v12 = vadd.f32 %v2333_v8, %v1029_v6 }
 0xa0e   :  { %v1440_v13 = vpop.f32.mrf.mxu1 }
 0xa0f   :  { %v1449_v15 = vadd.f32 %v1440_v13, %v1024_v11  ;;  %v1907_v13 = vsub.s32 2, %v2618_v14 }
 0xa10   :  { %v1603_v17 = vpop.f32.mrf.mxu1 }
 0xa11   :  { %v1608_v20 = vmul.f32 0.35355338, %v1603_v17 }
 0xa12   :  { %v2343_v21 = vpop.f32.mrf.mxu1 }
 0xa13   :  { %v1612_v22 = vsel %vm198_vm2, %v1608_v20, -inf  ;;  %v1913_v21 = vsub.s32 3, %v2618_v14 }
 0xa14   :  { %1613 = vmax.xlane.f32.xlu0 %v1612_v22 }
 0xa18   :  { %1622 = vadd.xlane.f32.xlu0 %v1621_v24 }
 0xa2e   :  { %1631 = vrot.lane.b32.xlu0 %v2629_v31, %s2513_s4 }
 0xa9d   :  { %v1614_v18 = vpop.xlane.xlu0 %1613 }
 0xa9e   :  { %v1616_v25 = vsub.f32 %v1608_v20, %v1614_v18  ;;  %v1908_v20 = vrot.slane %v2621_v16, %v1907_v13  ;;  %v1914_v18 = vrot.slane %v2621_v16, %v1913_v21 }
 0xaa0   :  { %v1619_v26 = vmul.f32 1.442695, %v1616_v25 }
 0xaa1   :  { %v1623_v19 = vpop.xlane.xlu0 %1622 }
 0xaa2   :  { %2441 = vpow2.f32 %v1619_v26 }
 0xaa3   :  { %2443 = vrcp.f32 %v1623_v19 }
 0xaa5   :  { %v1632_v27 = vpop.permute.xlu0 %1631 }
 0xaa6   :  { %2345 = vmatpush3.msra.mxu0 %v1632_v27  ;;  %v48_v27 = vld [vmem:[%s2860_s3 + $0x18] sm:$0xff] }
 0xaaf   :  { %v2442_v28 = vpop.eup %2441 }
 0xab0   :  { %v2444_v29 = vpop.eup %2443  ;;  %v1624_v30 = vsel %vm198_vm2, %v2442_v28, 0.0 }
 0xab1   :  { %1625 = vadd.xlane.f32.xlu1 %v1624_v30  ;;  %v1629_v32 = vmul.f32 %v2444_v29, %v2440_v0  ;;  %v46_v29 = vld [vmem:[%s2860_s3 + $0x8] sm:$0xff]  ;;  %v45_v30 = vld [vmem:[%s2860_s3] sm:$0xff] }
 0xab3   :  { %2347 = vmatmul.mubr.msk.f32.vlgmr.msra.gmra.mxu0 %vm198_vm2, %v1629_v32  ;;  %v1919_v32 = vsub.s32 4, %v2618_v14 }
 0xac2   :  { %1707 = vrot.lane.b32.xlu1 %v2624_v23, %s2513_s4 }
 0xac6   :  { %1784 = vrot.lane.b32.xlu1 %v2555_v1, %s2501_s18 }
 0xb3a   :  { %v1626_v31 = vpop.xlane.xlu1 %1625 }
 0xb3b   :  { %2445 = vrcp.f32 %v1626_v31  ;;  %v1920_v31 = vrot.slane %v2621_v16, %v1919_v32 }
 0xb3e   :  { %v1708_v33 = vpop.permute.xlu1 %1707 }
 0xb3f   :  { %2350 = vmatpush3.msra.mxu1 %v1708_v33 }
 0xb42   :  { %v1785_v34 = vpop.permute.xlu1 %1784 }
 0xb43   :  { %2354 = vmatprep.subr.mxu0 %v1785_v34 }
 0xb44   :  { %2355 = vmatpush3.msra.mxu0 %v1785_v34 }
 0xb48   :  { %v2446_v35 = vpop.eup %2445 }
 0xb49   :  { %v1630_v37 = vmul.f32 %v2446_v35, %v2442_v28  ;;  %v47_v28 = vld [vmem:[%s2860_s3 + $0x10] sm:$0xff] }
 0xb4b   :  { %2352 = vmatmul.mubr.msk.f32.vlgmr.msra.gmra.mxu1 %vm198_vm2, %v1630_v37 }
 0xb73   :  { %v1703_v36 = vpop.f32.mrf.mxu0 }
 0xb74   :  { %2356 = vmatprep.mubr.msk.f32.mxu0 %vm198_vm2, %v1703_v36 }
 0xb75   :  { %v2348_v47 = vpop.f32.mrf.mxu0 }
 0xc0b   :  { %v1779_v38 = vpop.f32.mrf.mxu1 }
 0xc0c   :  { %2357 = vmatmul.mubr.msk.f32.vlgmr.msra.gmra.mxu0 %vm198_vm2, %v1779_v38  ;;  %v2018_v38 = vsub.s32 5, %v2618_v14 }
 0xc0d   :  { %v2353_v23 = vpop.f32.mrf.mxu1 }
 0xc0e   :  { %v2019_v23 = vrot.slane %v2621_v16, %v2018_v38 }
 0xccc   :  { %v2358_v42 = vpop.f32.mrf.mxu0 }
 0xccd   :  { %v1869_v43 = vadd.f32 %v2358_v42, %v1450_v12 }
 0xcce   :  { %v1859_v44 = vpop.f32.mrf.mxu0 }
 0xccf   :  { %v1875_v45 = vadd.f32 %v1873_v40, %v1869_v43  ;;  %v1868_v46 = vadd.f32 %v1859_v44, %v1449_v15 }
 0xcd1   :  { %v1874_v48 = vadd.f32 %v1873_v40, %v1868_v46  ;;  %v1877_v49 = vadd.f32 %v1875_v45, %v2598_v10 }
 0xcd3   :  { %v1881_v50 = vsel %vm63_vm0, %v1877_v49, 0.0  ;;  %v1876_v41 = vadd.f32 %v1874_v48, %v2593_v9 }
 0xcd4   :  { %1882 = vadd.xlane.f32.xlu1 %v1881_v50 }
 0xcd5   :  { %v1878_v51 = vsel %vm63_vm0, %v1876_v41, 0.0 }
 0xcd6   :  { %1879 = vadd.xlane.f32.xlu0 %v1878_v51 }
 0xce5   :  { %1927 = vrot.lane.b32.xlu1 %v2555_v1, %s2503_s21 }
 0xce9   :  { %1923 = vrot.lane.b32.xlu1 %v2573_v5, %s2503_s21  ;;  %v52_v5 = vld [vmem:[%s2860_s3 + $0x38] sm:$0xff] }
 0xcea   :  { %2370 = vmatprep.subr.mxu0 %v52_v5 }
 0xceb   :  { %2371 = vmatpush3.msra.mxu0 %v52_v5 }
 0xced   :  { %1921 = vrot.lane.b32.xlu1 %v2583_v7, %s2503_s21  ;;  %v51_v7 = vld [vmem:[%s2860_s3 + $0x30] sm:$0xff] }
 0xcee   :  { %2372 = vmatprep.subr.mxu0 %v51_v7 }
 0xcef   :  { %2373 = vmatpush3.msra.mxu0 %v51_v7  ;;  %v2132_v7 = vsub.s32 6, %v2618_v14 }
 0xcf0   :  { %2374 = vmatprep.subr.mxu0 %v50_v60 }
 0xcf1   :  { %2375 = vmatpush3.msra.mxu0 %v50_v60  ;;  %v2138_v60 = vsub.s32 7, %v2618_v14 }
 0xd5d   :  { %v1883_v52 = vpop.xlane.xlu1 %1882 }
 0xd5e   :  { %v1886_v53 = vmul.f32 0.03125, %v1883_v52 }
 0xd5f   :  { %v1880_v10 = vpop.xlane.xlu0 %1879 }
 0xd60   :  { %v1888_v54 = vsub.f32 %v1877_v49, %v1886_v53  ;;  %v1885_v55 = vmul.f32 0.03125, %v1880_v10 }
 0xd61   :  { %v1928_v1 = vpop.permute.xlu1 %1927 }
 0xd62   :  { %v1887_v56 = vsub.f32 %v1876_v41, %v1885_v55  ;;  %v1890_v9 = vmul.f32 %v1888_v54, %v1888_v54  ;;  %2359 = vmatprep.subr.mxu1 %v1928_v1 }
 0xd63   :  { %2360 = vmatpush3.msra.mxu1 %v1928_v1 }
 0xd64   :  { %v1894_v57 = vsel %vm63_vm0, %v1890_v9, 0.0  ;;  %v1889_v58 = vmul.f32 %v1887_v56, %v1887_v56 }
 0xd65   :  { %1895 = vadd.xlane.f32.xlu0 %v1894_v57  ;;  %v1924_v4 = vpop.permute.xlu1 %1923 }
 0xd66   :  { %v1891_v59 = vsel %vm63_vm0, %v1889_v58, 0.0 }
 0xd69   :  { %1892 = vadd.xlane.f32.xlu0 %v1891_v59  ;;  %v1922_v12 = vpop.permute.xlu1 %1921 }
 0xd7f   :  { %1925 = vrot.lane.b32.xlu0 %v2563_v3, %s2503_s21  ;;  %v49_v3 = vld [vmem:[%s2860_s3 + $0x20] sm:$0xff]  ;;  %s2514_s3 = smov [#allocation5]  }
 0xd80   :  { %2376 = vmatprep.subr.mxu0 %v49_v3  ;;  %s2149_s0 = sshll.u32 %s2514_s3, 4  ;;  %s2150_s0 = int_to_ptr.vmem [resolvable:$true] %s2149_s0 }
 0xd81   :  { %2377 = vmatpush3.msra.mxu0 %v49_v3  ;;  %v2133_v3 = vrot.slane %v2621_v16, %v2132_v7  ;;  %s2475_s19 = scalar_lea.vmem %s2150_s0, 256  ;;  %p2480_p6 = scmp.lt.s32.totalorder %s2150_s0, %s2150_s0 }
 0xd82   :  { %2378 = vmatprep.subr.mxu0 %v48_v27  ;;  %p2476_p5 = scmp.ne.s32.totalorder %s2150_s0, %s2475_s19  ;;  %p2481_p7 = scmp.lt.s32.totalorder %s2475_s19, %s2475_s19 }
 0xd83   :  { %2379 = vmatpush3.msra.mxu0 %v48_v27 }
 0xd84   :  { %2380 = vmatprep.subr.mxu0 %v47_v28  ;;  %p2482_p8 = por %p2481_p7, %p2480_p6 }
 0xd85   :  { %2381 = vmatpush3.msra.mxu0 %v47_v28 }
 0xd86   :  { %2382 = vmatprep.subr.mxu0 %v46_v29  ;;  %p2483_p9 = pnand %p2482_p8, %p2476_p5 }
 0xd87   :  { %2383 = vmatpush3.msra.mxu0 %v46_v29 }
 0xd88   :  { %2384 = vmatprep.subr.mxu0 %v45_v30 }
 0xd89   :  { %2385 = vmatpush3.msra.mxu0 %v45_v30 }
 0xdee   :  { %v1896_v61 = vpop.xlane.xlu0 %1895 }
 0xdef   :  { %v1898_v62 = vmul.f32 0.03125, %v1896_v61 }
 0xdf1   :  { %v1900_v63 = vadd.f32 1e-05, %v1898_v62 }
 0xdf2   :  { %v1893_v2 = vpop.xlane.xlu0 %1892 }
 0xdf3   :  { %2447 = vrsqrt.f32 %v1900_v63  ;;  %v1897_v6 = vmul.f32 0.03125, %v1893_v2  ;;  %v2139_v63 = vrot.slane %v2621_v16, %v2138_v60 }
 0xdf5   :  { %v1899_v8 = vadd.f32 1e-05, %v1897_v6 }
 0xdf6   :  { %v1926_v11 = vpop.permute.xlu0 %1925 }
 0xdf7   :  { %2449 = vrsqrt.f32 %v1899_v8  ;;  %2361 = vmatprep.subr.mxu1 %v1926_v11 }
 0xdf8   :  { %2362 = vmatpush3.msra.mxu1 %v1926_v11 }
 0xdf9   :  { %2363 = vmatprep.subr.mxu1 %v1924_v4 }
 0xdfa   :  { %2364 = vmatpush3.msra.mxu1 %v1924_v4 }
 0xdfb   :  { %2365 = vmatprep.subr.mxu1 %v1922_v12 }
 0xdfc   :  { %2366 = vmatpush3.msra.mxu1 %v1922_v12 }
 0xe00   :  { %v2448_v15 = vpop.eup %2447 }
 0xe01   :  { %v1904_v17 = vmul.f32 %v2448_v15, %v1888_v54 }
 0xe03   :  { %v1910_v24 = vmul.f32 %v1908_v20, %v1904_v17 }
 0xe04   :  { %v2450_v22 = vpop.eup %2449 }
 0xe05   :  { %v1903_v0 = vmul.f32 %v2450_v22, %v1887_v56  ;;  %v1916_v19 = vadd.f32 %v1914_v18, %v1910_v24 }
 0xe07   :  { %v1909_v25 = vmul.f32 %v1908_v20, %v1903_v0 }
 0xe09   :  { %v1915_v26 = vadd.f32 %v1914_v18, %v1909_v25 }
 0xe0b   :  { %2367 = vmatprep.mubr.msk.f32.mxu1 %vm63_vm0, %v1915_v26 }
 0xe0c   :  { %2368 = vmatmul.mubr.msk.f32.vlgmr.msra.gmra.mxu1 %vm63_vm0, %v1916_v19 }
 0xecc   :  { %v2369_v33 = vpop.f32.mrf.mxu1 }
 0xecd   :  { %v2011_v34 = vadd.f32 %v2369_v33, %v1920_v31 }
 0xece   :  { %v2005_v35 = vpop.f32.mrf.mxu1 }
 0xecf   :  { %v2006_v37 = vadd.f32 %v2005_v35, %v1920_v31  ;;  %v2015_v47 = vmax.f32 %v2011_v34, 0.0 }
 0xed1   :  { %v2014_v36 = vmax.f32 %v2006_v37, 0.0 }
 0xed3   :  { %2386 = vmatprep.mubr.msk.f32.mxu0 %vm2020_vm3, %v2014_v36 }
 0xed4   :  { %2387 = vmatmul.mubr.msk.f32.vlgmr.msra.gmra.mxu0 %vm2020_vm3, %v2015_v47 }
 0xf94   :  { %v2388_v39 = vpop.f32.mrf.mxu0 }
 0xf95   :  { %v2099_v40 = vadd.f32 %v2388_v39, %v2019_v23 }
 0xf96   :  { %v2093_v42 = vpop.f32.mrf.mxu0 }
 0xf97   :  { %v2094_v43 = vadd.f32 %v2093_v42, %v2019_v23  ;;  %v2103_v44 = vadd.f32 %v2099_v40, %v1916_v19 }
 0xf99   :  { %v2107_v45 = vsel %vm63_vm0, %v2103_v44, 0.0  ;;  %v2102_v46 = vadd.f32 %v2094_v43, %v1915_v26 }
 0xf9a   :  { %2108 = vadd.xlane.f32.xlu1 %v2107_v45 }
 0xf9b   :  { %v2104_v48 = vsel %vm63_vm0, %v2102_v46, 0.0 }
 0xf9c   :  { %2105 = vadd.xlane.f32.xlu0 %v2104_v48 }
0x1023   :  { %v2109_v49 = vpop.xlane.xlu1 %2108 }
0x1024   :  { %v2111_v50 = vmul.f32 0.03125, %v2109_v49 }
0x1025   :  { %v2106_v41 = vpop.xlane.xlu0 %2105 }
0x1026   :  { %v2110_v51 = vmul.f32 0.03125, %v2106_v41  ;;  %v2113_v52 = vsub.f32 %v2103_v44, %v2111_v50 }
0x1028   :  { %v2112_v53 = vsub.f32 %v2102_v46, %v2110_v51  ;;  %v2115_v55 = vmul.f32 %v2113_v52, %v2113_v52 }
0x102a   :  { %v2114_v10 = vmul.f32 %v2112_v53, %v2112_v53  ;;  %v2119_v56 = vsel %vm63_vm0, %v2115_v55, 0.0 }
0x102c   :  { %v2116_v54 = vsel %vm63_vm0, %v2114_v10, 0.0 }
0x102d   :  { %2117 = vadd.xlane.f32.xlu0 %v2116_v54 }
0x1031   :  { %2120 = vadd.xlane.f32.xlu0 %v2119_v56 }
0x10b6   :  { %v2118_v9 = vpop.xlane.xlu0 %2117 }
0x10b7   :  { %v2122_v57 = vmul.f32 0.03125, %v2118_v9 }
0x10b9   :  { %v2124_v58 = vadd.f32 1e-05, %v2122_v57 }
0x10ba   :  { %v2121_v59 = vpop.xlane.xlu0 %2120 }
0x10bb   :  { %2451 = vrsqrt.f32 %v2124_v58  ;;  %v2123_v1 = vmul.f32 0.03125, %v2121_v59 }
0x10bd   :  { %v2125_v5 = vadd.f32 1e-05, %v2123_v1 }
0x10bf   :  { %2453 = vrsqrt.f32 %v2125_v5 }
0x10c8   :  { %v2452_v61 = vpop.eup %2451 }
0x10c9   :  { %v2128_v62 = vmul.f32 %v2452_v61, %v2112_v53 }
0x10cb   :  { %v2134_v2 = vmul.f32 %v2133_v3, %v2128_v62 }
0x10cc   :  { %v2454_v4 = vpop.eup %2453 }
0x10cd   :  { %v2129_v6 = vmul.f32 %v2454_v4, %v2113_v52  ;;  %v2140_v8 = vadd.f32 %v2139_v63, %v2134_v2 }
0x10cf   :  { %v2135_v11 = vmul.f32 %v2133_v3, %v2129_v6  ;;  %2142 = vst.msk [vmem:[#allocation5] sm:$0xff] %vm63_vm0, %v2140_v8 }
0x10d1   :  { %v2141_v12 = vadd.f32 %v2139_v63, %v2135_v11 }
0x10d3   :  { %2143 = vst.msk [vmem:[#allocation5 + $0x8] sm:$0xff] %vm63_vm0, %v2141_v12 }
0x10d4   :  { %2486 = shalt.err (!%p2483_p9)
}
0x10d5   :  { %s2515_s20 = smov 128   ;;  %s2516_s21 = smov 8  }
0x10d6   :  { %2155 = dma.vmem_to_hbm [thread:$0]  %s2150_s0, 256, %s2862_s5, [#allocation4], %s2515_s20, %s2515_s20, %s2516_s21  }
0x10d7   :  { %2497 = dma.done.wait [#allocation4], 256  }
0x10d8   :  { %2498 = vsyncadd [#allocation4], 4294967040 }
0x10d9   :  { %2159 = vsyncpa [#allocation3], 1 }
0x10da   :  { %2160 = vsyncpa [#allocation4], 1 }

</bundles_post_ra>
